<compile_context>
chip_gen: v5e
topology: v5e:2x2
jax: 0.10.0
libtpu: 0.0.40
codegen_flags: <defaults>
</compile_context>

<pallas_src>
import functools

import jax
import jax.numpy as jnp
from jax.experimental import pallas as pl
from jax.experimental.pallas import tpu as pltpu


OUT_PAD = 128  # fc4 padded output width (lane-dense store)


def dnn_kernel(x_ref, w1_ref, b1_ref, w2_ref, b2_ref,
               w3_ref, b3_ref, w4_ref, b4_ref, o_ref):
    # fc1 -> relu   (bf16 x bf16 matmul, f32 accumulate)
    h = jnp.dot(x_ref[...], w1_ref[...], preferred_element_type=jnp.float32)
    h = jnp.maximum(h + b1_ref[...], 0.0)
    # fc2 -> relu
    h = jnp.dot(h.astype(jnp.bfloat16), w2_ref[...],
                preferred_element_type=jnp.float32)
    h = jnp.maximum(h + b2_ref[...], 0.0)
    # fc3 -> relu
    h = jnp.dot(h.astype(jnp.bfloat16), w3_ref[...],
                preferred_element_type=jnp.float32)
    h = jnp.maximum(h + b3_ref[...], 0.0)
    # fc4 (padded to 128 lane-dense columns) -> sigmoid
    z = jnp.dot(h.astype(jnp.bfloat16), w4_ref[...],
                preferred_element_type=jnp.float32)
    z = z + b4_ref[...]
    o_ref[...] = jax.nn.sigmoid(z)


def _round_up(n, m):
    return ((n + m - 1) // m) * m


def _choose_batch_tile(b_padded):
    """b_padded is a multiple of 8.  Returns a tile that is a multiple of 8."""
    if b_padded >= 1024:
        return 256           # big tiles: MXU M well filled, few grid steps
    if b_padded >= 256:
        return 128
    if b_padded >= 16 and (b_padded // 2) % 8 == 0:
        return b_padded // 2  # 2 parallel tiles -> both v7x TensorCores busy
    return b_padded           # single shot for the tiniest batches


@functools.partial(jax.jit, static_argnames=())
def dnn_forward(x, params):
    """x: [B, input_size] float32 -> [B, 1] float32."""
    (w1, b1), (w2, b2), (w3, b3), (w4, b4) = params
    B, in_dim = x.shape

    # --- lane-dense final layer: pad fc4 (64,1)/(1,1) -> (64,128)/(1,128) ---
    w4p = jnp.zeros((w4.shape[0], OUT_PAD), w4.dtype).at[:, :1].set(w4)
    b4p = jnp.zeros((1, OUT_PAD), b4.dtype).at[:, :1].set(b4)

    # --- bf16 MXU operands (accumulation stays f32 inside the kernel) ---
    xb = x.astype(jnp.bfloat16)
    w1b = w1.astype(jnp.bfloat16)
    w2b = w2.astype(jnp.bfloat16)
    w3b = w3.astype(jnp.bfloat16)
    w4b = w4p.astype(jnp.bfloat16)

    # --- batch tiling: pad to a multiple of 8, pick tile, pad to tile ---
    Bp = _round_up(B, 8)
    batch_tile = _choose_batch_tile(Bp)
    Bp = _round_up(Bp, batch_tile)
    if Bp != B:
        xb = jnp.pad(xb, ((0, Bp - B), (0, 0)))
    grid = (Bp // batch_tile,)

    def full_spec(shape):
        # Whole-array block, same block for every batch tile.
        return pl.BlockSpec(shape, lambda i: (0,) * len(shape))

    out = pl.pallas_call(
        dnn_kernel,
        out_shape=jax.ShapeDtypeStruct((Bp, OUT_PAD), jnp.float32),
        grid_spec=pltpu.PrefetchScalarGridSpec(
            num_scalar_prefetch=0,
            grid=grid,
            in_specs=[
                pl.BlockSpec((batch_tile, in_dim), lambda i: (i, 0)),  # x tile
                full_spec(w1b.shape), full_spec(b1.shape),
                full_spec(w2b.shape), full_spec(b2.shape),
                full_spec(w3b.shape), full_spec(b3.shape),
                full_spec(w4b.shape), full_spec(b4p.shape),
            ],
            out_specs=pl.BlockSpec((batch_tile, OUT_PAD), lambda i: (i, 0)),
        ),
        compiler_params=pltpu.CompilerParams(
            dimension_semantics=("parallel",),
            vmem_limit_bytes=32 * 1024 * 1024,
        ),
    )(xb, w1b, b1, w2b, b2, w3b, b3, w4b, b4p)

    # Drop batch padding and the 127 zero-padded output columns.
    return out[:B, :1]


def init_params(key, input_size):
    """Deterministic params matching nn.Linear shapes (stored pre-transposed
    as (in, out) so every layer is a lane-dense x @ W + b)."""
    sizes = [(input_size, 256), (256, 128), (128, 64), (64, 1)]
    params = []
    for fan_in, fan_out in sizes:
        key, wk = jax.random.split(key)
        std = (2.0 / (fan_in + fan_out)) ** 0.5
        w = std * jax.random.normal(wk, (fan_in, fan_out), dtype=jnp.float32)
        b = jnp.zeros((1, fan_out), dtype=jnp.float32)
        params.append((w, b))
    return params


def dnn_reference(x, params):
    """Pure-JAX f32 reference of the same forward pass."""
    (w1, b1), (w2, b2), (w3, b3), (w4, b4) = params
    h = jnp.maximum(x @ w1 + b1, 0.0)
    h = jnp.maximum(h @ w2 + b2, 0.0)
    h = jnp.maximum(h @ w3 + b3, 0.0)
    return jax.nn.sigmoid(h @ w4 + b4)


if __name__ == "__main__":
    key = jax.random.PRNGKey(0)
    input_size = 32
    batch = 16

    key, xk, pk = jax.random.split(key, 3)
    x = jax.random.normal(xk, (batch, input_size), dtype=jnp.float32)
    params = init_params(pk, input_size)

    out = dnn_forward(x, params)
    out = jax.block_until_ready(out)

    ref = dnn_reference(x, params)
    assert out.shape == (batch, 1), out.shape
    # bf16 MXU operands with f32 accumulation: loose tolerance vs f32 ref.
    assert jnp.allclose(out, ref, atol=1e-2, rtol=1e-2), "mismatch vs reference"

    # Also exercise the multi-tile / large-batch path (tile=128, grid=(2,)).
    key, xk2 = jax.random.split(key)
    x2 = jax.random.normal(xk2, (256, input_size), dtype=jnp.float32)
    out2 = jax.block_until_ready(dnn_forward(x2, params))
    ref2 = dnn_reference(x2, params)
    assert out2.shape == (256, 1), out2.shape
    assert jnp.allclose(out2, ref2, atol=1e-2, rtol=1e-2), "mismatch (batch=256)"

    print("KERNEL_OK")
</pallas_src>

<mosaic_0001>
module attributes {stable_mosaic.version = 11 : i64} {
  func.func @dnn_kernel(%arg0: i32, %arg1: memref<8x32xbf16, #tpu.memory_space<vmem>>, %arg2: memref<32x256xbf16, #tpu.memory_space<vmem>>, %arg3: memref<1x256xf32, #tpu.memory_space<vmem>>, %arg4: memref<256x128xbf16, #tpu.memory_space<vmem>>, %arg5: memref<1x128xf32, #tpu.memory_space<vmem>>, %arg6: memref<128x64xbf16, #tpu.memory_space<vmem>>, %arg7: memref<1x64xf32, #tpu.memory_space<vmem>>, %arg8: memref<64x128xbf16, #tpu.memory_space<vmem>>, %arg9: memref<1x128xf32, #tpu.memory_space<vmem>>, %arg10: memref<8x128xf32, #tpu.memory_space<vmem>>) attributes {dimension_semantics = [#tpu.dimension_semantics<parallel>], iteration_bounds = array<i64: 2>, scalar_prefetch = 0 : i64, scratch_operands = 0 : i64, tpu.core_type = #tpu.core_type<tc>, window_params = [{transform_indices = @transform_0, window_bounds = array<i64: 8, 32>}, {pipeline_mode = #tpu.pipeline_mode<synchronous>, transform_indices = @transform_1, window_bounds = array<i64: 32, 256>}, {pipeline_mode = #tpu.pipeline_mode<synchronous>, transform_indices = @transform_2, window_bounds = array<i64: 1, 256>}, {pipeline_mode = #tpu.pipeline_mode<synchronous>, transform_indices = @transform_3, window_bounds = array<i64: 256, 128>}, {pipeline_mode = #tpu.pipeline_mode<synchronous>, transform_indices = @transform_4, window_bounds = array<i64: 1, 128>}, {pipeline_mode = #tpu.pipeline_mode<synchronous>, transform_indices = @transform_5, window_bounds = array<i64: 128, 64>}, {pipeline_mode = #tpu.pipeline_mode<synchronous>, transform_indices = @transform_6, window_bounds = array<i64: 1, 64>}, {pipeline_mode = #tpu.pipeline_mode<synchronous>, transform_indices = @transform_7, window_bounds = array<i64: 64, 128>}, {pipeline_mode = #tpu.pipeline_mode<synchronous>, transform_indices = @transform_8, window_bounds = array<i64: 1, 128>}, {transform_indices = @transform_9, window_bounds = array<i64: 8, 128>}]} {
    %c0 = arith.constant 0 : index
    %c0_0 = arith.constant 0 : index
    %0 = vector.load %arg1[%c0, %c0_0] : memref<8x32xbf16, #tpu.memory_space<vmem>>, vector<8x32xbf16>
    %c0_1 = arith.constant 0 : index
    %c0_2 = arith.constant 0 : index
    %1 = vector.load %arg2[%c0_1, %c0_2] : memref<32x256xbf16, #tpu.memory_space<vmem>>, vector<32x256xbf16>
    %cst = arith.constant dense<0.000000e+00> : vector<8x256xf32>
    %2 = tpu.matmul %0, %1, %cst {dimension_numbers = #tpu.dot_dimension_numbers<[1], [0], [0], [1], [0, 0, 1, 1], [], []>} : vector<8x32xbf16>, vector<32x256xbf16>, vector<8x256xf32> -> vector<8x256xf32>
    %c0_3 = arith.constant 0 : index
    %c0_4 = arith.constant 0 : index
    %3 = vector.load %arg3[%c0_3, %c0_4] : memref<1x256xf32, #tpu.memory_space<vmem>>, vector<1x256xf32>
    %4 = vector.broadcast %3 : vector<1x256xf32> to vector<8x256xf32>
    %5 = arith.addf %2, %4 : vector<8x256xf32>
    %cst_5 = arith.constant 0.000000e+00 : f32
    %6 = vector.broadcast %cst_5 : f32 to vector<8x256xf32>
    %7 = arith.maximumf %5, %6 : vector<8x256xf32>
    %8 = arith.truncf %7 : vector<8x256xf32> to vector<8x256xbf16>
    %c0_6 = arith.constant 0 : index
    %c0_7 = arith.constant 0 : index
    %9 = vector.load %arg4[%c0_6, %c0_7] : memref<256x128xbf16, #tpu.memory_space<vmem>>, vector<256x128xbf16>
    %cst_8 = arith.constant dense<0.000000e+00> : vector<8x128xf32>
    %10 = tpu.matmul %8, %9, %cst_8 {dimension_numbers = #tpu.dot_dimension_numbers<[1], [0], [0], [1], [0, 0, 1, 1], [], []>} : vector<8x256xbf16>, vector<256x128xbf16>, vector<8x128xf32> -> vector<8x128xf32>
    %c0_9 = arith.constant 0 : index
    %c0_10 = arith.constant 0 : index
    %11 = vector.load %arg5[%c0_9, %c0_10] : memref<1x128xf32, #tpu.memory_space<vmem>>, vector<1x128xf32>
    %12 = vector.broadcast %11 : vector<1x128xf32> to vector<8x128xf32>
    %13 = arith.addf %10, %12 : vector<8x128xf32>
    %cst_11 = arith.constant 0.000000e+00 : f32
    %14 = vector.broadcast %cst_11 : f32 to vector<8x128xf32>
    %15 = arith.maximumf %13, %14 : vector<8x128xf32>
    %16 = arith.truncf %15 : vector<8x128xf32> to vector<8x128xbf16>
    %c0_12 = arith.constant 0 : index
    %c0_13 = arith.constant 0 : index
    %17 = vector.load %arg6[%c0_12, %c0_13] : memref<128x64xbf16, #tpu.memory_space<vmem>>, vector<128x64xbf16>
    %cst_14 = arith.constant dense<0.000000e+00> : vector<8x64xf32>
    %18 = tpu.matmul %16, %17, %cst_14 {dimension_numbers = #tpu.dot_dimension_numbers<[1], [0], [0], [1], [0, 0, 1, 1], [], []>} : vector<8x128xbf16>, vector<128x64xbf16>, vector<8x64xf32> -> vector<8x64xf32>
    %c0_15 = arith.constant 0 : index
    %c0_16 = arith.constant 0 : index
    %19 = vector.load %arg7[%c0_15, %c0_16] : memref<1x64xf32, #tpu.memory_space<vmem>>, vector<1x64xf32>
    %20 = vector.broadcast %19 : vector<1x64xf32> to vector<8x64xf32>
    %21 = arith.addf %18, %20 : vector<8x64xf32>
    %cst_17 = arith.constant 0.000000e+00 : f32
    %22 = vector.broadcast %cst_17 : f32 to vector<8x64xf32>
    %23 = arith.maximumf %21, %22 : vector<8x64xf32>
    %24 = arith.truncf %23 : vector<8x64xf32> to vector<8x64xbf16>
    %c0_18 = arith.constant 0 : index
    %c0_19 = arith.constant 0 : index
    %25 = vector.load %arg8[%c0_18, %c0_19] : memref<64x128xbf16, #tpu.memory_space<vmem>>, vector<64x128xbf16>
    %cst_20 = arith.constant dense<0.000000e+00> : vector<8x128xf32>
    %26 = tpu.matmul %24, %25, %cst_20 {dimension_numbers = #tpu.dot_dimension_numbers<[1], [0], [0], [1], [0, 0, 1, 1], [], []>} : vector<8x64xbf16>, vector<64x128xbf16>, vector<8x128xf32> -> vector<8x128xf32>
    %c0_21 = arith.constant 0 : index
    %c0_22 = arith.constant 0 : index
    %27 = vector.load %arg9[%c0_21, %c0_22] : memref<1x128xf32, #tpu.memory_space<vmem>>, vector<1x128xf32>
    %28 = vector.broadcast %27 : vector<1x128xf32> to vector<8x128xf32>
    %29 = arith.addf %26, %28 : vector<8x128xf32>
    %30 = arith.negf %29 : vector<8x128xf32>
    %31 = math.exp %30 : vector<8x128xf32>
    %cst_23 = arith.constant 1.000000e+00 : f32
    %32 = vector.broadcast %cst_23 : f32 to vector<8x128xf32>
    %33 = arith.addf %32, %31 : vector<8x128xf32>
    %34 = arith.divf %32, %33 : vector<8x128xf32>
    %c0_24 = arith.constant 0 : index
    %c0_25 = arith.constant 0 : index
    %35 = vector.load %arg10[%c0_24, %c0_25] : memref<8x128xf32, #tpu.memory_space<vmem>>, vector<8x128xf32>
    tpu.vector_store %arg10[%c0_24, %c0_25], %34 {strides = array<i32>} : memref<8x128xf32, #tpu.memory_space<vmem>>, vector<8x128xf32>,
    return
  }
  func.func @transform_0(%arg0: i32) -> (i32, i32) {
    %c0_i32 = arith.constant 0 : i32
    %c0_i32_0 = arith.constant 0 : i32
    return %arg0, %c0_i32 : i32, i32
  }
  func.func @transform_1(%arg0: i32) -> (i32, i32) {
    %c0_i32 = arith.constant 0 : i32
    %c0_i32_0 = arith.constant 0 : i32
    %c0_i32_1 = arith.constant 0 : i32
    return %c0_i32, %c0_i32_0 : i32, i32
  }
  func.func @transform_2(%arg0: i32) -> (i32, i32) {
    %c0_i32 = arith.constant 0 : i32
    %c0_i32_0 = arith.constant 0 : i32
    %c0_i32_1 = arith.constant 0 : i32
    return %c0_i32, %c0_i32_0 : i32, i32
  }
  func.func @transform_3(%arg0: i32) -> (i32, i32) {
    %c0_i32 = arith.constant 0 : i32
    %c0_i32_0 = arith.constant 0 : i32
    %c0_i32_1 = arith.constant 0 : i32
    return %c0_i32, %c0_i32_0 : i32, i32
  }
  func.func @transform_4(%arg0: i32) -> (i32, i32) {
    %c0_i32 = arith.constant 0 : i32
    %c0_i32_0 = arith.constant 0 : i32
    %c0_i32_1 = arith.constant 0 : i32
    return %c0_i32, %c0_i32_0 : i32, i32
  }
  func.func @transform_5(%arg0: i32) -> (i32, i32) {
    %c0_i32 = arith.constant 0 : i32
    %c0_i32_0 = arith.constant 0 : i32
    %c0_i32_1 = arith.constant 0 : i32
    return %c0_i32, %c0_i32_0 : i32, i32
  }
  func.func @transform_6(%arg0: i32) -> (i32, i32) {
    %c0_i32 = arith.constant 0 : i32
    %c0_i32_0 = arith.constant 0 : i32
    %c0_i32_1 = arith.constant 0 : i32
    return %c0_i32, %c0_i32_0 : i32, i32
  }
  func.func @transform_7(%arg0: i32) -> (i32, i32) {
    %c0_i32 = arith.constant 0 : i32
    %c0_i32_0 = arith.constant 0 : i32
    %c0_i32_1 = arith.constant 0 : i32
    return %c0_i32, %c0_i32_0 : i32, i32
  }
  func.func @transform_8(%arg0: i32) -> (i32, i32) {
    %c0_i32 = arith.constant 0 : i32
    %c0_i32_0 = arith.constant 0 : i32
    %c0_i32_1 = arith.constant 0 : i32
    return %c0_i32, %c0_i32_0 : i32, i32
  }
  func.func @transform_9(%arg0: i32) -> (i32, i32) {
    %c0_i32 = arith.constant 0 : i32
    %c0_i32_0 = arith.constant 0 : i32
    return %arg0, %c0_i32 : i32, i32
  }
}

</mosaic_0001>

<bundles_post_ra>
// kernel: dnn_forward.1
= control target key start
LH: loop header
LB: loop body
LE: loop exit
PB: predicated region body
PF: predicated region fallthrough
CT: control target
= control target key end

     0   :  { %s1009_s30 = smov 0   ;;  %s1150_s0 = inlined_call_operand.vmem [shape: bf16[16,32], index: 0, kind: input, shape index: {}]   ;;  %s1151_s1 = inlined_call_operand.vmem [shape: bf16[32,256], index: 1, kind: input, shape index: {}]   ;;  %s1152_s2 = inlined_call_operand.vmem [shape: f32[1,256], index: 2, kind: input, shape index: {}]   ;;  %s1153_s3 = inlined_call_operand.vmem [shape: bf16[256,128], index: 3, kind: input, shape index: {}]   ;;  %s1154_s4 = inlined_call_operand.vmem [shape: f32[1,128], index: 4, kind: input, shape index: {}]   ;;  %s1155_s5 = inlined_call_operand.vmem [shape: bf16[128,64], index: 5, kind: input, shape index: {}]   ;;  %s1156_s6 = inlined_call_operand.vmem [shape: f32[1,64], index: 6, kind: input, shape index: {}]   ;;  %s1157_s7 = inlined_call_operand.vmem [shape: bf16[64,128], index: 7, kind: input, shape index: {}]   ;;  %s1158_s8 = inlined_call_operand.vmem [shape: f32[1,128], index: 8, kind: input, shape index: {}]   ;;  %s1159_s9 = inlined_call_operand.vmem [shape: f32[16,128], index: 9, kind: output, shape index: {}]  }
   0x1 LB: > { %s763_s10 = sadd.s32 4294967295, %s957_s30   ;;  %p767_p0 = scmp.ge.s32.totalorder %s957_s30, 1  ;;  %s957_s30 = sphi %s1009_s30, %s19_s30  }
   0x2   : > { %p286_p1 = scmp.lt.s32.totalorder %s957_s30, 3 }
   0x4   : > { %p287_p2 = pnand %p767_p0, %p286_p1 }
   0x5   : > { %p320_p3 = scmp.lt.s32.totalorder (!%p287_p2), %s763_s10, 1 }
   0x6   : > { %290 = sbr.rel (%p287_p2) target bundleno = 582 (0x246), region = 56 }
   0xb   : > { %v780_v0 = vld [vmem:[%s1151_s1 + $0x10] sm:$0xf]  ;;  %v907_v1 = vld [vmem:[%s1151_s1 + $0x14] sm:$0xf0]  ;;  %v906_v2 = vld [vmem:[%s1151_s1 + $0x14] sm:$0xf] }
   0xc   : > { %v781_v3 = vor.u32 %v907_v1, %v780_v0  ;;  %v782_v4 = vld [vmem:[%s1151_s1 + $0x18] sm:$0xf0]  ;;  %v772_v5 = vld [vmem:[%s1151_s1] sm:$0xf]  ;;  %v905_v6 = vld [vmem:[%s1151_s1 + $0x4] sm:$0xf0] }
   0xd   : > { %v785_v7 = vor.u32 %v906_v2, %v782_v4  ;;  %v904_v8 = vld [vmem:[%s1151_s1 + $0x4] sm:$0xf]  ;;  %v774_v9 = vld [vmem:[%s1151_s1 + $0x8] sm:$0xf0]  ;;  %v773_v10 = vor.u32 %v905_v6, %v772_v5  ;;  %v915_v11 = vld [vmem:[%s1153_s3 + $0x38] sm:$0xff]  ;;  %s1161_s10 = smov (!%p320_p3, %s763_s10), 1 }
   0xe   : > { %370 = vmatpush.bf16.msra.mxu0 %v781_v3  ;;  %v923_v12 = vld [vmem:[%s1153_s3 + $0x78] sm:$0xff]  ;;  %v777_v13 = vor.u32 %v904_v8, %v774_v9  ;;  %526 = vmatpush.bf16.msra.mxu2 %v915_v11  ;;  %v914_v14 = vld [vmem:[%s1153_s3 + $0x30] sm:$0xff]  ;;  %s768_s16 = sshll.u32 %s1161_s10, 2  ;;  %vm360_vm0 = vcmask 261120   ;;  %v913_v17 = vld [vmem:[%s1153_s3 + $0x28] sm:$0xff]  ;;  %vm673_vm1 = vcmask 523264  }
   0xf   : > { %383 = vmatpush.bf16.msra.mxu1 %v785_v7  ;;  %539 = vmatpush.bf16.msra.mxu3 %v923_v12  ;;  %v922_v15 = vld [vmem:[%s1153_s3 + $0x70] sm:$0xff]  ;;  %s323_s19 = scalar_lea.vmem %s1150_s0, %s768_s16  ;;  %v921_v18 = vld [vmem:[%s1153_s3 + $0x68] sm:$0xff]  ;;  %v912_v19 = vld [vmem:[%s1153_s3 + $0x20] sm:$0xff] }
  0x10   : > { %v329_v16 = vld [vmem:[%s323_s19] sm:$0xf]  ;;  %v911_v21 = vld [vmem:[%s1153_s3 + $0x18] sm:$0xff]  ;;  %v910_v23 = vld [vmem:[%s1153_s3 + $0x10] sm:$0xff]  ;;  %s769_s19 = sshll.u32 %s1161_s10, 3 }
  0x11   : > { %v920_v20 = vld [vmem:[%s1153_s3 + $0x60] sm:$0xff]  ;;  %v919_v22 = vld [vmem:[%s1153_s3 + $0x58] sm:$0xff]  ;;  %v918_v24 = vld [vmem:[%s1153_s3 + $0x50] sm:$0xff]  ;;  %s327_s22 = scalar_lea.vmem %s1159_s9, %s769_s19 }
  0x12   : > { %371 = vmatpush.bf16.msra.mxu0 %v773_v10  ;;  %527 = vmatpush.bf16.msra.mxu2 %v914_v14  ;;  %v909_v25 = vld [vmem:[%s1153_s3 + $0x8] sm:$0xff]  ;;  %v908_v27 = vld [vmem:[%s1153_s3] sm:$0xff]  ;;  %v931_v29 = vld [vmem:[%s1155_s5 + $0x38] sm:$0xff] }
  0x13   : > { %384 = vmatpush.bf16.msra.mxu1 %v777_v13  ;;  %540 = vmatpush.bf16.msra.mxu3 %v922_v15  ;;  %v917_v26 = vld [vmem:[%s1153_s3 + $0x48] sm:$0xff]  ;;  %v916_v28 = vld [vmem:[%s1153_s3 + $0x40] sm:$0xff]  ;;  %v930_v30 = vld [vmem:[%s1155_s5 + $0x30] sm:$0xff] }
  0x14   : > { %v929_v31 = vld [vmem:[%s1155_s5 + $0x28] sm:$0xff]  ;;  %v928_v32 = vld [vmem:[%s1155_s5 + $0x20] sm:$0xff]  ;;  %v927_v33 = vld [vmem:[%s1155_s5 + $0x18] sm:$0xff] }
  0x15   : > { %786 = vmatmul.msk.bf16.vlgmr.msra.gmra.mxu0 %vm360_vm0, %v329_v16  ;;  %v334_v34 = vld [vmem:[%s1152_s2] sm:$0x3]  ;;  %v926_v35 = vld [vmem:[%s1155_s5 + $0x10] sm:$0xff]  ;;  %v925_v48 = vld [vmem:[%s1155_s5 + $0x8] sm:$0xff] }
  0x16   : > { %787 = vmatmul.msk.bf16.vlgmr.msra.gmra.mxu1 %vm360_vm0, %v329_v16  ;;  %528 = vmatpush.bf16.msra.mxu2 %v913_v17  ;;  %v336_v36 = vperm.slane %v334_v34, 0  ;;  %v337_v37 = vperm.slane %v334_v34, 1  ;;  %v924_v49 = vld [vmem:[%s1155_s5] sm:$0xff]  ;;  %v935_v50 = vld [vmem:[%s1157_s7 + $0x18] sm:$0xff]  ;;  %v934_v51 = vld [vmem:[%s1157_s7 + $0x10] sm:$0xff] }
  0x17   : > { %541 = vmatpush.bf16.msra.mxu3 %v921_v18  ;;  %622 = vmatpush.bf16.msrb.mxu0 %v931_v29  ;;  %v933_v52 = vld [vmem:[%s1157_s7 + $0x8] sm:$0xff]  ;;  %v944_v53 = vld [vmem:[%s1154_s4] ss:$0 sm:$0xff] }
  0x18   : > { %681 = vmatpush.bf16.msrb.mxu1 %v935_v50  ;;  %v932_v62 = vld [vmem:[%s1157_s7] sm:$0xff] }
  0x19   : > { %v945_v63 = vld [vmem:[%s1156_s6] ss:$0 sm:$0xff] }
  0x1a   : > { %529 = vmatpush.bf16.msra.mxu2 %v912_v19  ;;  %v946_v5 = vld [vmem:[%s1158_s8] ss:$0 sm:$0xff] }
  0x1b   : > { %542 = vmatpush.bf16.msra.mxu3 %v920_v20  ;;  %623 = vmatpush.bf16.msrb.mxu0 %v930_v30 }
  0x1c   : > { %682 = vmatpush.bf16.msrb.mxu1 %v934_v51 }
  0x1e   : > { %530 = vmatpush.bf16.msra.mxu2 %v911_v21 }
  0x1f   : > { %543 = vmatpush.bf16.msra.mxu3 %v919_v22  ;;  %624 = vmatpush.bf16.msrb.mxu0 %v929_v31 }
  0x20   : > { %683 = vmatpush.bf16.msrb.mxu1 %v933_v52 }
  0x22   : > { %531 = vmatpush.bf16.msra.mxu2 %v910_v23 }
  0x23   : > { %544 = vmatpush.bf16.msra.mxu3 %v918_v24  ;;  %625 = vmatpush.bf16.msrb.mxu0 %v928_v32 }
  0x24   : > { %684 = vmatpush.bf16.msrb.mxu1 %v932_v62 }
  0x26   : > { %532 = vmatpush.bf16.msra.mxu2 %v909_v25 }
  0x27   : > { %545 = vmatpush.bf16.msra.mxu3 %v917_v26  ;;  %626 = vmatpush.bf16.msrb.mxu0 %v927_v33 }
  0x2a   : > { %533 = vmatpush.bf16.msra.mxu2 %v908_v27 }
  0x2b   : > { %546 = vmatpush.bf16.msra.mxu3 %v916_v28  ;;  %627 = vmatpush.bf16.msrb.mxu0 %v926_v35 }
  0x2f   : > { %628 = vmatpush.bf16.msrb.mxu0 %v925_v48 }
  0x33   : > { %629 = vmatpush.bf16.msrb.mxu0 %v924_v49 }
  0x92   : > { %v373_v38 = vpop.f32.mrf.mxu0 }
  0x93   : > { %v374_v39 = vadd.f32 %v373_v38, %v336_v36  ;;  %v386_v40 = vpop.f32.mrf.mxu1 }
  0x94   : > { %v387_v41 = vadd.f32 %v386_v40, %v337_v37 }
  0x95   : > { %v390_v42 = vmax.f32 %v374_v39, 0.0 }
  0x96   : > { %v391_v43 = vmax.f32 %v387_v41, 0.0 }
  0x97   : > { %v392_v44 = vpack.c.bf16 %v390_v42, %v390_v42 }
  0x98   : > { %v393_v45 = vpack.c.bf16 %v391_v43, %v391_v43 }
  0x99   : > { %534 = vmatmul.bf16.vlgmr.msra.gmra.mxu2 %v392_v44 }
  0x9a   : > { %547 = vmatmul.bf16.vlgmr.msra.gmra.mxu3 %v393_v45  ;;  %v375_v46 = vpop.f32.mrf.mxu0 }
  0x9b   : > { %v388_v47 = vpop.f32.mrf.mxu1 }
 0x11c   : > { %v535_v54 = vpop.f32.mrf.mxu2 }
 0x11d   : > { %v536_v55 = vadd.f32 %v944_v53, %v535_v54  ;;  %v548_v56 = vpop.f32.mrf.mxu3 }
 0x11f   : > { %v549_v57 = vadd.f32 %v548_v56, %v536_v55 }
 0x121   : > { %v552_v58 = vmax.f32 %v549_v57, 0.0 }
 0x123   : > { %v553_v59 = vpack.c.bf16 %v552_v58, %v552_v58 }
 0x124   : > { %v537_v60 = vpop.f32.mrf.mxu2 }
 0x125   : > { %v550_v61 = vpop.f32.mrf.mxu3  ;;  %630 = vmatmul.bf16.vlgmr.msrb.gmra.mxu0 %v553_v59 }
 0x1a2   : > { %v631_v0 = vpop.f32.mrf.mxu0 }
 0x1a3   : > { %v632_v1 = vadd.f32 %v945_v63, %v631_v0 }
 0x1a5   : > { %v635_v2 = vmax.f32 %v632_v1, 0.0 }
 0x1a7   : > { %v636_v3 = vpack.c.bf16 %v635_v2, %v635_v2 }
 0x1a9   : > { %900 = vmatmul.msk.bf16.vlgmr.msrb.gmra.mxu1 %vm673_vm1, %v636_v3 }
 0x1aa   : > { %v633_v4 = vpop.f32.mrf.mxu0 }
 0x226   : > { %v686_v6 = vpop.f32.mrf.mxu1 }
 0x227   : > { %v687_v7 = vadd.f32 %v946_v5, %v686_v6 }
 0x229   : > { %v901_v8 = vmul.f32 -1.442695, %v687_v7 }
 0x22b   : > { %947 = vpow2.f32 %v901_v8 }
 0x22e   : > { %v688_v9 = vpop.f32.mrf.mxu1 }
 0x231   : > { %v948_v10 = vpop.eup %947 }
 0x232   : > { %v693_v11 = vadd.f32 1.0, %v948_v10 }
 0x234   : > { %949 = vrcp.f32 %v693_v11  ;;  %v705_v15 = vand.u32 2147483648, %v693_v11  ;;  %v703_v17 = vand.u32 2147483647, %v693_v11  ;;  %vm699_vm3 = vweird.f32 %v693_v11 }
 0x236   : > { %v706_v19 = vor.u32 1.1754944e-38, %v705_v15  ;;  %vm704_vm5 = vcmp.eq.f32.partialorder %v703_v17, 8.507059e+37 }
 0x23a   : > { %v950_v12 = vpop.eup %949 }
 0x23b   : > { %v695_v13 = vmul.f32 %v950_v12, %v693_v11  ;;  %vm700_vm2 = vweird.f32 %v950_v12 }
 0x23c   : > { %vm701_vm4 = vmor %vm699_vm3, %vm700_vm2 }
 0x23d   : > { %v696_v14 = vsub.f32 1.0, %v695_v13 }
 0x23f   : > { %v697_v16 = vmul.f32 %v950_v12, %v696_v14 }
 0x241   : > { %v698_v18 = vadd.f32 %v950_v12, %v697_v16 }
 0x243   : > { %v702_v20 = vsel %vm701_vm4, %v950_v12, %v698_v18 }
 0x244   : > { %v707_v21 = vsel %vm704_vm5, %v706_v19, %v702_v20 }
 0x245   : > { %709 = vst [vmem:[%s327_s22] sm:$0xff] %v707_v21 }
 0x246 PF: > { %s19_s30 = sadd.s32 1, %s957_s30  }
 0x247   : > { %p16_p4 = scmp.ge.s32.totalorder %s19_s30, 4  }
 0x249   :  { %18 = sbr.rel (!%p16_p4) target bundleno = 1 (0x1), region = 86 }

</bundles_post_ra>
